<compile_context>
chip_gen: v6e
topology: v6e:2x2x1
jax: 0.10.0
libtpu: 0.0.40
codegen_flags: <defaults>
</compile_context>

<pallas_src>
import functools

import jax
import jax.numpy as jnp
from jax import lax
from jax.experimental import pallas as pl
from jax.experimental.pallas import tpu as pltpu

# ----------------------------------------------------------------------------
# Model hyper-parameters (match the PyTorch module construction).
# ----------------------------------------------------------------------------
VOCAB_SIZE = 50
EMB_DIM = 32
N_FILTERS = 16
FILTER_SIZES = (3, 4, 5)
FS_MAX = max(FILTER_SIZES)
MAX_PAD = FS_MAX - 1
F_TOTAL = len(FILTER_SIZES) * N_FILTERS
OUTPUT_DIM = 4
PAD_IDX = 0


# ----------------------------------------------------------------------------
# Fused Pallas kernel
# ----------------------------------------------------------------------------
def _textcnn_fused_kernel(bt, l_pad, ids_ref, table_ref, w_all_ref, b_all_ref,
                          fc_w_ref, fc_b_ref, out_ref):
    """Fused TextCNN forward for one batch tile of `bt` rows.

    ids_ref  : [bt*l_pad, 1] int32  token ids, sequence pre-padded with MAX_PAD
               positions on each side (pad value is irrelevant: padded
               positions are zeroed in-kernel).
    table_ref: [V, D] f32 embedding table.
    w_all_ref: [FS_MAX*D, F_TOTAL] f32 conv weights packed along the filter
               axis (branch b at cols [b*F,(b+1)*F), tap j at rows
               [j*D,(j+1)*D); unused taps are zero).
    b_all_ref: [1, F_TOTAL] f32 conv biases (branch-concatenated).
    fc_w_ref : [F_TOTAL, OUT] f32.   fc_b_ref : [1, OUT] f32.
    out_ref  : [bt, OUT] f32 logits.
    """
    n = bt * l_pad
    vocab, d = table_ref.shape
    k_all, f_total = w_all_ref.shape
    fs_max = k_all // d
    max_pad = fs_max - 1
    seq = l_pad - 2 * max_pad
    l_out = l_pad - max_pad              # conv output length = seq + fs_max - 1
    n_win = n - max_pad                  # number of window starts in flat layout

    # ---- embedding lookup: one-hot @ table (exact, MXU-friendly, no gather) ----
    ids = ids_ref[...]                                             # [n, 1] i32
    vocab_iota = lax.broadcasted_iota(jnp.int32, (n, vocab), 1)
    onehot = (ids == vocab_iota).astype(jnp.float32)               # [n, V]
    emb = jnp.dot(onehot, table_ref[...],
                  preferred_element_type=jnp.float32)              # [n, D]

    # ---- zero the padded positions (exact zero-padding conv semantics,
    #      independent of the embedding table's pad row) ----
    pos = lax.broadcasted_iota(jnp.int32, (n, 1), 0)
    in_seq = None
    for b in range(bt):
        lo = b * l_pad + max_pad
        term = jnp.logical_and(pos >= lo, pos < lo + seq)
        in_seq = term if in_seq is None else jnp.logical_or(in_seq, term)
    emb = jnp.where(in_seq, emb, 0.0)

    # ---- im2col over the widest (fs_max-tap) window, flat over (batch, time) ----
    cols = jnp.concatenate([emb[k:k + n_win, :] for k in range(fs_max)],
                           axis=-1)                                # [n_win, fs_max*D]

    # ---- all conv branches as one lane-dense matmul; bias + ReLU ----
    conv = jnp.dot(cols, w_all_ref[...],
                   preferred_element_type=jnp.float32)             # [n_win, F_TOTAL]
    conv = jnp.maximum(conv + b_all_ref[...], 0.0)

    # ---- per-branch valid-window mask (narrower filters start later) ----
    g_idx = lax.broadcasted_iota(jnp.int32, (l_out, f_total), 0)
    col_idx = lax.broadcasted_iota(jnp.int32, (l_out, f_total), 1)
    min_g = jnp.zeros((l_out, f_total), jnp.int32)
    for b_idx, fs in enumerate(FILTER_SIZES):
        in_branch = jnp.logical_and(col_idx >= b_idx * N_FILTERS,
                                    col_idx < (b_idx + 1) * N_FILTERS)
        min_g = jnp.where(in_branch, fs_max - fs, min_g)
    valid_win = g_idx >= min_g                                     # [l_out, F_TOTAL]

    # ---- max-pool over time per batch row (post-ReLU values >= 0, so masking
    #      invalid windows to 0 is neutral for the max) ----
    pooled_rows = []
    for b in range(bt):
        seg = conv[b * l_pad:b * l_pad + l_out, :]                 # [l_out, F_TOTAL]
        seg = jnp.where(valid_win, seg, 0.0)
        pooled_rows.append(jnp.max(seg, axis=0, keepdims=True))    # [1, F_TOTAL]
    pooled = jnp.concatenate(pooled_rows, axis=0)                  # [bt, F_TOTAL]

    # ---- final FC epilogue (dropout is identity at inference) ----
    out_ref[...] = (jnp.dot(pooled, fc_w_ref[...],
                            preferred_element_type=jnp.float32) + fc_b_ref[...])


def _forward_impl(packed, text):
    B, S = text.shape
    l_pad = S + 2 * MAX_PAD
    bt = B if B <= 8 else 8                     # batch rows per grid step

    # Tiny int glue: pad the token ids once with MAX_PAD per side and flatten
    # to a column so the kernel never needs a lane<->sublane reshape.
    ids = jnp.pad(text.astype(jnp.int32), ((0, 0), (MAX_PAD, MAX_PAD)),
                  constant_values=PAD_IDX)
    ids = ids.reshape(B * l_pad, 1)

    kernel = functools.partial(_textcnn_fused_kernel, bt, l_pad)
    return pl.pallas_call(
        kernel,
        out_shape=jax.ShapeDtypeStruct((B, OUTPUT_DIM), jnp.float32),
        grid=(pl.cdiv(B, bt),),
        in_specs=[
            pl.BlockSpec((bt * l_pad, 1), lambda i: (i, 0)),
            pl.BlockSpec((VOCAB_SIZE, EMB_DIM), lambda i: (0, 0)),
            pl.BlockSpec((FS_MAX * EMB_DIM, F_TOTAL), lambda i: (0, 0)),
            pl.BlockSpec((1, F_TOTAL), lambda i: (0, 0)),
            pl.BlockSpec((F_TOTAL, OUTPUT_DIM), lambda i: (0, 0)),
            pl.BlockSpec((1, OUTPUT_DIM), lambda i: (0, 0)),
        ],
        out_specs=pl.BlockSpec((bt, OUTPUT_DIM), lambda i: (i, 0)),
        compiler_params=pltpu.CompilerParams(
            dimension_semantics=("parallel",)),
    )(ids, packed["embedding"], packed["w_all"], packed["b_all"],
      packed["fc_w"], packed["fc_b"])


cnn_forward = jax.jit(_forward_impl)


# ----------------------------------------------------------------------------
# Parameters
# ----------------------------------------------------------------------------
def init_params(key):
    keys = jax.random.split(key, 3 + 2 * len(FILTER_SIZES))
    emb = 0.1 * jax.random.normal(keys[0], (VOCAB_SIZE, EMB_DIM), jnp.float32)
    emb = emb.at[PAD_IDX].set(0.0)              # padding_idx row is zero
    conv_w, conv_b = [], []
    for i, fs in enumerate(FILTER_SIZES):
        conv_w.append(0.1 * jax.random.normal(keys[1 + 2 * i],
                                              (fs, EMB_DIM, N_FILTERS), jnp.float32))
        conv_b.append(0.1 * jax.random.normal(keys[2 + 2 * i],
                                              (1, N_FILTERS), jnp.float32))
    fc_w = 0.1 * jax.random.normal(keys[-2], (F_TOTAL, OUTPUT_DIM), jnp.float32)
    fc_b = 0.1 * jax.random.normal(keys[-1], (1, OUTPUT_DIM), jnp.float32)
    return dict(embedding=emb, conv_w=conv_w, conv_b=conv_b, fc_w=fc_w, fc_b=fc_b)


def pack_params(params):
    """One-time repack: conv weights packed along the filter axis for the
    fused im2col matmul; biases concatenated."""
    w_all = jnp.zeros((FS_MAX * EMB_DIM, F_TOTAL), jnp.float32)
    for b_idx, (fs, w) in enumerate(zip(FILTER_SIZES, params["conv_w"])):
        w_all = w_all.at[:fs * EMB_DIM,
                         b_idx * N_FILTERS:(b_idx + 1) * N_FILTERS].set(
                             w.reshape(fs * EMB_DIM, N_FILTERS))
    b_all = jnp.concatenate(params["conv_b"], axis=1)              # [1, F_TOTAL]
    return dict(embedding=params["embedding"], w_all=w_all, b_all=b_all,
                fc_w=params["fc_w"], fc_b=params["fc_b"])


# ----------------------------------------------------------------------------
# Pure-jnp reference (mirrors the PyTorch module)
# ----------------------------------------------------------------------------
def cnn_reference(params, text):
    emb = params["embedding"][text]                                # [B, S, D]
    pooled = []
    for fs, w, b in zip(FILTER_SIZES, params["conv_w"], params["conv_b"]):
        pad = fs - 1
        emb_p = jnp.pad(emb, ((0, 0), (pad, pad), (0, 0)))
        l_out = emb_p.shape[1] - fs + 1
        acc = jnp.zeros((emb.shape[0], l_out, N_FILTERS), jnp.float32)
        for k in range(fs):
            acc += jnp.einsum("bld,df->blf", emb_p[:, k:k + l_out, :], w[k])
        acc = jnp.maximum(acc + b[None, :, :], 0.0)
        pooled.append(jnp.max(acc, axis=1))
    cat = jnp.concatenate(pooled, axis=1)
    return cat @ params["fc_w"] + params["fc_b"]


if __name__ == "__main__":
    key = jax.random.PRNGKey(0)
    pkey, tkey = jax.random.split(key)
    params = init_params(pkey)
    packed = pack_params(params)

    batch, seq_len = 2, 8
    text = jax.random.randint(tkey, (batch, seq_len), 0, VOCAB_SIZE, dtype=jnp.int32)
    text = text.at[0, -2:].set(PAD_IDX)         # include some pad tokens

    out = jax.block_until_ready(cnn_forward(packed, text))
    ref = cnn_reference(params, text)

    assert out.shape == (batch, OUTPUT_DIM)
    assert jnp.allclose(out, ref, atol=1e-4, rtol=1e-4)

    print("KERNEL_OK")
</pallas_src>

<mosaic_0001>
module attributes {stable_mosaic.version = 11 : i64} {
  func.func @_textcnn_fused_kernel(%arg0: i32, %arg1: memref<32x1xi32, #tpu.memory_space<vmem>>, %arg2: memref<50x32xf32, #tpu.memory_space<vmem>>, %arg3: memref<160x48xf32, #tpu.memory_space<vmem>>, %arg4: memref<1x48xf32, #tpu.memory_space<vmem>>, %arg5: memref<48x4xf32, #tpu.memory_space<vmem>>, %arg6: memref<1x4xf32, #tpu.memory_space<vmem>>, %arg7: memref<2x4xf32, #tpu.memory_space<vmem>>) attributes {dimension_semantics = [#tpu.dimension_semantics<parallel>], iteration_bounds = array<i64: 1>, scalar_prefetch = 0 : i64, scratch_operands = 0 : i64, tpu.core_type = #tpu.core_type<tc>, window_params = [{transform_indices = @transform_0, window_bounds = array<i64: 32, 1>}, {pipeline_mode = #tpu.pipeline_mode<synchronous>, transform_indices = @transform_1, window_bounds = array<i64: 50, 32>}, {pipeline_mode = #tpu.pipeline_mode<synchronous>, transform_indices = @transform_2, window_bounds = array<i64: 160, 48>}, {pipeline_mode = #tpu.pipeline_mode<synchronous>, transform_indices = @transform_3, window_bounds = array<i64: 1, 48>}, {pipeline_mode = #tpu.pipeline_mode<synchronous>, transform_indices = @transform_4, window_bounds = array<i64: 48, 4>}, {pipeline_mode = #tpu.pipeline_mode<synchronous>, transform_indices = @transform_5, window_bounds = array<i64: 1, 4>}, {transform_indices = @transform_6, window_bounds = array<i64: 2, 4>}]} {
    %c0 = arith.constant 0 : index
    %c0_0 = arith.constant 0 : index
    %0 = vector.load %arg1[%c0, %c0_0] : memref<32x1xi32, #tpu.memory_space<vmem>>, vector<32x1xi32>
    %1 = tpu.iota {dimensions = array<i32: 1>} : vector<32x50xi32>
    %2 = vector.broadcast %0 : vector<32x1xi32> to vector<32x50xi32>
    %3 = arith.cmpi eq, %2, %1 : vector<32x50xi32>
    %4 = arith.extui %3 : vector<32x50xi1> to vector<32x50xi32>
    %5 = arith.sitofp %4 : vector<32x50xi32> to vector<32x50xf32>
    %c0_1 = arith.constant 0 : index
    %c0_2 = arith.constant 0 : index
    %6 = vector.load %arg2[%c0_1, %c0_2] : memref<50x32xf32, #tpu.memory_space<vmem>>, vector<50x32xf32>
    %cst = arith.constant dense<0.000000e+00> : vector<32x32xf32>
    %7 = tpu.matmul %5, %6, %cst {dimension_numbers = #tpu.dot_dimension_numbers<[1], [0], [0], [1], [0, 0, 1, 1], [], []>} : vector<32x50xf32>, vector<50x32xf32>, vector<32x32xf32> -> vector<32x32xf32>
    %8 = tpu.iota {dimensions = array<i32: 0>} : vector<32x1xi32>
    %c4_i32 = arith.constant 4 : i32
    %9 = vector.broadcast %c4_i32 : i32 to vector<32x1xi32>
    %10 = arith.cmpi sge, %8, %9 : vector<32x1xi32>
    %c12_i32 = arith.constant 12 : i32
    %11 = vector.broadcast %c12_i32 : i32 to vector<32x1xi32>
    %12 = arith.cmpi slt, %8, %11 : vector<32x1xi32>
    %13 = arith.andi %10, %12 : vector<32x1xi1>
    %c20_i32 = arith.constant 20 : i32
    %14 = vector.broadcast %c20_i32 : i32 to vector<32x1xi32>
    %15 = arith.cmpi sge, %8, %14 : vector<32x1xi32>
    %c28_i32 = arith.constant 28 : i32
    %16 = vector.broadcast %c28_i32 : i32 to vector<32x1xi32>
    %17 = arith.cmpi slt, %8, %16 : vector<32x1xi32>
    %18 = arith.andi %15, %17 : vector<32x1xi1>
    %19 = arith.ori %13, %18 : vector<32x1xi1>
    %cst_3 = arith.constant 0.000000e+00 : f32
    %20 = vector.shape_cast %19 : vector<32x1xi1> to vector<32x1xi1>
    %21 = vector.broadcast %20 : vector<32x1xi1> to vector<32x32xi1>
    %22 = vector.broadcast %cst_3 : f32 to vector<32x32xf32>
    %23 = arith.select %21, %7, %22 : vector<32x32xi1>, vector<32x32xf32>
    %24 = vector.extract_strided_slice %23 {offsets = [0, 0], sizes = [28, 32], strides = [1, 1]} : vector<32x32xf32> to vector<28x32xf32>
    %25 = vector.extract_strided_slice %23 {offsets = [1, 0], sizes = [28, 32], strides = [1, 1]} : vector<32x32xf32> to vector<28x32xf32>
    %26 = vector.extract_strided_slice %23 {offsets = [2, 0], sizes = [28, 32], strides = [1, 1]} : vector<32x32xf32> to vector<28x32xf32>
    %27 = vector.extract_strided_slice %23 {offsets = [3, 0], sizes = [28, 32], strides = [1, 1]} : vector<32x32xf32> to vector<28x32xf32>
    %28 = vector.extract_strided_slice %23 {offsets = [4, 0], sizes = [28, 32], strides = [1, 1]} : vector<32x32xf32> to vector<28x32xf32>
    %29 = tpu.concatenate %24, %25, %26, %27, %28 in 1 : vector<28x32xf32>, vector<28x32xf32>, vector<28x32xf32>, vector<28x32xf32>, vector<28x32xf32> -> vector<28x160xf32>
    %c0_4 = arith.constant 0 : index
    %c0_5 = arith.constant 0 : index
    %30 = vector.load %arg3[%c0_4, %c0_5] : memref<160x48xf32, #tpu.memory_space<vmem>>, vector<160x48xf32>
    %cst_6 = arith.constant dense<0.000000e+00> : vector<28x48xf32>
    %31 = tpu.matmul %29, %30, %cst_6 {dimension_numbers = #tpu.dot_dimension_numbers<[1], [0], [0], [1], [0, 0, 1, 1], [], []>} : vector<28x160xf32>, vector<160x48xf32>, vector<28x48xf32> -> vector<28x48xf32>
    %c0_7 = arith.constant 0 : index
    %c0_8 = arith.constant 0 : index
    %32 = vector.load %arg4[%c0_7, %c0_8] : memref<1x48xf32, #tpu.memory_space<vmem>>, vector<1x48xf32>
    %33 = vector.broadcast %32 : vector<1x48xf32> to vector<28x48xf32>
    %34 = arith.addf %31, %33 : vector<28x48xf32>
    %cst_9 = arith.constant 0.000000e+00 : f32
    %35 = vector.broadcast %cst_9 : f32 to vector<28x48xf32>
    %36 = arith.maximumf %34, %35 : vector<28x48xf32>
    %37 = tpu.iota {dimensions = array<i32: 0>} : vector<12x48xi32>
    %38 = tpu.iota {dimensions = array<i32: 1>} : vector<12x48xi32>
    %c0_i32 = arith.constant 0 : i32
    %39 = vector.broadcast %c0_i32 : i32 to vector<12x48xi32>
    %c0_i32_10 = arith.constant 0 : i32
    %40 = vector.broadcast %c0_i32_10 : i32 to vector<12x48xi32>
    %41 = arith.cmpi sge, %38, %40 : vector<12x48xi32>
    %c16_i32 = arith.constant 16 : i32
    %42 = vector.broadcast %c16_i32 : i32 to vector<12x48xi32>
    %43 = arith.cmpi slt, %38, %42 : vector<12x48xi32>
    %44 = arith.andi %41, %43 : vector<12x48xi1>
    %c2_i32 = arith.constant 2 : i32
    %45 = vector.broadcast %c2_i32 : i32 to vector<12x48xi32>
    %46 = arith.select %44, %45, %39 : vector<12x48xi1>, vector<12x48xi32>
    %c16_i32_11 = arith.constant 16 : i32
    %47 = vector.broadcast %c16_i32_11 : i32 to vector<12x48xi32>
    %48 = arith.cmpi sge, %38, %47 : vector<12x48xi32>
    %c32_i32 = arith.constant 32 : i32
    %49 = vector.broadcast %c32_i32 : i32 to vector<12x48xi32>
    %50 = arith.cmpi slt, %38, %49 : vector<12x48xi32>
    %51 = arith.andi %48, %50 : vector<12x48xi1>
    %c1_i32 = arith.constant 1 : i32
    %52 = vector.broadcast %c1_i32 : i32 to vector<12x48xi32>
    %53 = arith.select %51, %52, %46 : vector<12x48xi1>, vector<12x48xi32>
    %c32_i32_12 = arith.constant 32 : i32
    %54 = vector.broadcast %c32_i32_12 : i32 to vector<12x48xi32>
    %55 = arith.cmpi sge, %38, %54 : vector<12x48xi32>
    %c48_i32 = arith.constant 48 : i32
    %56 = vector.broadcast %c48_i32 : i32 to vector<12x48xi32>
    %57 = arith.cmpi slt, %38, %56 : vector<12x48xi32>
    %58 = arith.andi %55, %57 : vector<12x48xi1>
    %c0_i32_13 = arith.constant 0 : i32
    %59 = vector.broadcast %c0_i32_13 : i32 to vector<12x48xi32>
    %60 = arith.select %58, %59, %53 : vector<12x48xi1>, vector<12x48xi32>
    %61 = arith.cmpi sge, %37, %60 : vector<12x48xi32>
    %62 = vector.extract_strided_slice %36 {offsets = [0, 0], sizes = [12, 48], strides = [1, 1]} : vector<28x48xf32> to vector<12x48xf32>
    %cst_14 = arith.constant 0.000000e+00 : f32
    %63 = vector.broadcast %cst_14 : f32 to vector<12x48xf32>
    %64 = arith.select %61, %62, %63 : vector<12x48xi1>, vector<12x48xf32>
    %cst_15 = arith.constant dense<0xFF800000> : vector<48xf32>
    %65 = vector.multi_reduction <maximumf>, %64, %cst_15 [0] : vector<12x48xf32> to vector<48xf32>
    %66 = vector.shape_cast %65 : vector<48xf32> to vector<1x48xf32>
    %67 = vector.extract_strided_slice %36 {offsets = [16, 0], sizes = [12, 48], strides = [1, 1]} : vector<28x48xf32> to vector<12x48xf32>
    %cst_16 = arith.constant 0.000000e+00 : f32
    %68 = vector.broadcast %cst_16 : f32 to vector<12x48xf32>
    %69 = arith.select %61, %67, %68 : vector<12x48xi1>, vector<12x48xf32>
    %cst_17 = arith.constant dense<0xFF800000> : vector<48xf32>
    %70 = vector.multi_reduction <maximumf>, %69, %cst_17 [0] : vector<12x48xf32> to vector<48xf32>
    %71 = vector.shape_cast %70 : vector<48xf32> to vector<1x48xf32>
    %72 = tpu.concatenate %66, %71 in 0 : vector<1x48xf32>, vector<1x48xf32> -> vector<2x48xf32>
    %c0_18 = arith.constant 0 : index
    %c0_19 = arith.constant 0 : index
    %73 = vector.load %arg5[%c0_18, %c0_19] : memref<48x4xf32, #tpu.memory_space<vmem>>, vector<48x4xf32>
    %cst_20 = arith.constant dense<0.000000e+00> : vector<2x4xf32>
    %74 = tpu.matmul %72, %73, %cst_20 {dimension_numbers = #tpu.dot_dimension_numbers<[1], [0], [0], [1], [0, 0, 1, 1], [], []>} : vector<2x48xf32>, vector<48x4xf32>, vector<2x4xf32> -> vector<2x4xf32>
    %c0_21 = arith.constant 0 : index
    %c0_22 = arith.constant 0 : index
    %75 = vector.load %arg6[%c0_21, %c0_22] : memref<1x4xf32, #tpu.memory_space<vmem>>, vector<1x4xf32>
    %76 = vector.broadcast %75 : vector<1x4xf32> to vector<2x4xf32>
    %77 = arith.addf %74, %76 : vector<2x4xf32>
    %c0_23 = arith.constant 0 : index
    %c0_24 = arith.constant 0 : index
    %78 = vector.load %arg7[%c0_23, %c0_24] : memref<2x4xf32, #tpu.memory_space<vmem>>, vector<2x4xf32>
    tpu.vector_store %arg7[%c0_23, %c0_24], %77 {strides = array<i32>} : memref<2x4xf32, #tpu.memory_space<vmem>>, vector<2x4xf32>,
    return
  }
  func.func @transform_0(%arg0: i32) -> (i32, i32) {
    %c0_i32 = arith.constant 0 : i32
    %c0_i32_0 = arith.constant 0 : i32
    return %arg0, %c0_i32 : i32, i32
  }
  func.func @transform_1(%arg0: i32) -> (i32, i32) {
    %c0_i32 = arith.constant 0 : i32
    %c0_i32_0 = arith.constant 0 : i32
    %c0_i32_1 = arith.constant 0 : i32
    return %c0_i32, %c0_i32_0 : i32, i32
  }
  func.func @transform_2(%arg0: i32) -> (i32, i32) {
    %c0_i32 = arith.constant 0 : i32
    %c0_i32_0 = arith.constant 0 : i32
    %c0_i32_1 = arith.constant 0 : i32
    return %c0_i32, %c0_i32_0 : i32, i32
  }
  func.func @transform_3(%arg0: i32) -> (i32, i32) {
    %c0_i32 = arith.constant 0 : i32
    %c0_i32_0 = arith.constant 0 : i32
    %c0_i32_1 = arith.constant 0 : i32
    return %c0_i32, %c0_i32_0 : i32, i32
  }
  func.func @transform_4(%arg0: i32) -> (i32, i32) {
    %c0_i32 = arith.constant 0 : i32
    %c0_i32_0 = arith.constant 0 : i32
    %c0_i32_1 = arith.constant 0 : i32
    return %c0_i32, %c0_i32_0 : i32, i32
  }
  func.func @transform_5(%arg0: i32) -> (i32, i32) {
    %c0_i32 = arith.constant 0 : i32
    %c0_i32_0 = arith.constant 0 : i32
    %c0_i32_1 = arith.constant 0 : i32
    return %c0_i32, %c0_i32_0 : i32, i32
  }
  func.func @transform_6(%arg0: i32) -> (i32, i32) {
    %c0_i32 = arith.constant 0 : i32
    %c0_i32_0 = arith.constant 0 : i32
    return %arg0, %c0_i32 : i32, i32
  }
}

</mosaic_0001>

<bundles_post_ra>
// kernel: _forward_impl.1
= control target key start
LH: loop header
LB: loop body
LE: loop exit
PB: predicated region body
PF: predicated region fallthrough
CT: control target
= control target key end

     0   :  { %vm74_vm0 = vcmask 1041408   ;;  %v676_v2 = vmov 0   ;;  %v677_v7 = vmov 0.0   ;;  %s960_s0 = inlined_call_operand.vmem [shape: s32[32,1], index: 0, kind: input, shape index: {}]   ;;  %s961_s1 = inlined_call_operand.vmem [shape: f32[50,32], index: 1, kind: input, shape index: {}]   ;;  %s962_s2 = inlined_call_operand.vmem [shape: f32[160,48], index: 2, kind: input, shape index: {}]   ;;  %s963_s3 = inlined_call_operand.vmem [shape: f32[1,48], index: 3, kind: input, shape index: {}]   ;;  %s964_s4 = inlined_call_operand.vmem [shape: f32[48,4], index: 4, kind: input, shape index: {}]   ;;  %s965_s5 = inlined_call_operand.vmem [shape: f32[1,4], index: 5, kind: input, shape index: {}]   ;;  %s966_s6 = inlined_call_operand.hbm [shape: f32[2,4], index: 6, kind: output, shape index: {}]  }
   0x1   :  { %v26_v0 = vld [vmem:[%s960_s0 + $0x10] sm:$0xff]  ;;  %v24_v1 = vld [vmem:[%s960_s0] sm:$0xff]  ;;  %638 = vset.pattern.permute.xlu1 %v676_v2  ;;  %637 = vset.pattern.permute.xlu0 %v676_v2  ;;  %v59_v4 = vld [vmem:[%s961_s1 + $0x28] sm:$0xff] }
   0x2   :  { %v60_v3 = vld [vmem:[%s961_s1 + $0x30] sm:$0x3]  ;;  %37 = vperm.xlu1 %638, %v26_v0   ;;  %31 = vperm.xlu0 %637, %v24_v1   ;;  %v27_v5 = vld [vmem:[%s960_s0 + $0x18] sm:$0xff]  ;;  %v25_v6 = vld [vmem:[%s960_s0 + $0x8] sm:$0xff] }
   0x3   :  { %595 = vmatprep.subr.msk.mxu0 %vm74_vm0, %v60_v3  ;;  %330 = vmatprep.subr.mxu1 %v677_v7 }
   0x4   :  { %11 = vsyncpa [#allocation3], 0  ;;  %596 = vmatpush3.msk.msra.mxu0 %vm74_vm0, %v60_v3  ;;  %v58_v8 = vld [vmem:[%s961_s1 + $0x20] sm:$0xff]  ;;  %v57_v9 = vld [vmem:[%s961_s1 + $0x18] sm:$0xff]  ;;  %v28_v13 = vlaneseq  ;;  %vm61_vm1 = vcmask 408576   ;;  %vm272_vm8 = vcmask 1043456  }
   0x5   :  { %597 = vmatprep.subr.mxu0 %v59_v4  ;;  %v56_v10 = vld [vmem:[%s961_s1 + $0x10] sm:$0xff]  ;;  %v55_v11 = vld [vmem:[%s961_s1 + $0x8] sm:$0xff]  ;;  %v54_v12 = vld [vmem:[%s961_s1] sm:$0xff]  ;;  %vm280_vm10 = vcmask 261120   ;;  %vm232_vm12 = vcmask 1045504   ;;  %vm212_vm13 = vcmask 1046528  }
   0x6   :  { %40 = vperm.xlu1 %638, %v27_v5   ;;  %34 = vperm.xlu0 %637, %v25_v6   ;;  %v756_v14 = vand.u32 127, %v28_v13  ;;  %v310_v23 = vld [vmem:[%s962_s2 + $0x78] sm:$0xff]  ;;  %v309_v24 = vld [vmem:[%s962_s2 + $0x70] sm:$0xff]  ;;  %v308_v25 = vld [vmem:[%s962_s2 + $0x68] sm:$0xff]  ;;  %v831_v39 = vshrl.u32 %v28_v13, 7  ;;  %vm252_vm14 = vcmask 1044480  }
   0x7   :  { %598 = vmatpush3.msra.mxu0 %v59_v4  ;;  %331 = vmatpush1.msra.mxu1 %v310_v23  ;;  %v307_v26 = vld [vmem:[%s962_s2 + $0x60] sm:$0xff]  ;;  %v306_v27 = vld [vmem:[%s962_s2 + $0x58] sm:$0xff]  ;;  %v305_v28 = vld [vmem:[%s962_s2 + $0x50] sm:$0xff]  ;;  %s679_s7 = smov 32   ;;  %s680_s8 = smov 96   ;;  %vm285_vm15 = vcmask 523264  }
   0x8   :  { %599 = vmatprep.subr.mxu0 %v58_v8  ;;  %332 = vmatprep.subr.mxu1 %v677_v7  ;;  %v304_v29 = vld [vmem:[%s962_s2 + $0x48] sm:$0xff]  ;;  %v303_v30 = vld [vmem:[%s962_s2 + $0x40] sm:$0xff]  ;;  %v302_v31 = vld [vmem:[%s962_s2 + $0x38] sm:$0xff]  ;;  %v834_v40 = vadd.s32 8, %v831_v39  ;;  %vm168_vm7 = vcmp.ge.s32.totalorder %v831_v39, 4  ;;  %v166_v42 = vadd.s32 16, %v831_v39 }
   0x9   :  { %600 = vmatpush3.msra.mxu0 %v58_v8  ;;  %333 = vmatpush1.msra.mxu1 %v309_v24  ;;  %v301_v32 = vld [vmem:[%s962_s2 + $0x30] sm:$0xff]  ;;  %v300_v33 = vld [vmem:[%s962_s2 + $0x28] sm:$0xff]  ;;  %v299_v34 = vld [vmem:[%s962_s2 + $0x20] sm:$0xff]  ;;  %v167_v46 = vadd.s32 24, %v831_v39  ;;  %vm290_vm0 = vcmask 785408   ;;  %s682_s21 = smov [#allocation2]  }
   0xa   :  { %601 = vmatprep.subr.mxu0 %v57_v9  ;;  %334 = vmatprep.subr.mxu1 %v677_v7  ;;  %v298_v35 = vld [vmem:[%s962_s2 + $0x18] sm:$0xff]  ;;  %v297_v36 = vld [vmem:[%s962_s2 + $0x10] sm:$0xff]  ;;  %v296_v37 = vld [vmem:[%s962_s2 + $0x8] sm:$0xff]  ;;  %vm173_vm6 = vcmp.lt.s32.totalorder %v834_v40, 12  ;;  %vm182_vm9 = vcmp.ge.s32.totalorder %v166_v42, 20  ;;  %s553_s22 = sshll.u32 %s682_s21, 4  ;;  %s554_s22 = int_to_ptr.vmem [resolvable:$true] %s553_s22 }
   0xb   :  { %602 = vmatpush3.msra.mxu0 %v57_v9  ;;  %335 = vmatpush1.msra.mxu1 %v308_v25  ;;  %v295_v38 = vld [vmem:[%s962_s2] sm:$0xff]  ;;  %v314_v43 = vld [vmem:[%s962_s2 + $0x98] sm:$0xff]  ;;  %v313_v44 = vld [vmem:[%s962_s2 + $0x90] sm:$0xff]  ;;  %vm187_vm11 = vcmp.lt.s32.totalorder %v167_v46, 28  ;;  %s654_s23 = scalar_lea.vmem %s554_s22, 32  ;;  %p659_p1 = scmp.lt.s32.totalorder %s554_s22, %s554_s22 }
   0xc   :  { %603 = vmatprep.subr.mxu0 %v56_v10  ;;  %336 = vmatprep.subr.mxu1 %v677_v7  ;;  %v312_v52 = vld [vmem:[%s962_s2 + $0x88] sm:$0xff]  ;;  %v311_v53 = vld [vmem:[%s962_s2 + $0x80] sm:$0xff]  ;;  %s678_s2 = smov 64   ;;  %p655_p0 = scmp.ne.s32.totalorder %s554_s22, %s654_s23 }
   0xd   :  { %604 = vmatpush3.msra.mxu0 %v56_v10  ;;  %337 = vmatpush1.msra.mxu1 %v307_v26  ;;  %p660_p2 = scmp.lt.s32.totalorder %s654_s23, %s654_s23 }
   0xe   :  { %605 = vmatprep.subr.mxu0 %v55_v11  ;;  %338 = vmatprep.subr.mxu1 %v677_v7 }
   0xf   :  { %606 = vmatpush3.msra.mxu0 %v55_v11  ;;  %339 = vmatpush1.msra.mxu1 %v306_v27  ;;  %p661_p3 = por %p660_p2, %p659_p1 }
  0x10   :  { %607 = vmatprep.subr.mxu0 %v54_v12  ;;  %340 = vmatprep.subr.mxu1 %v677_v7 }
  0x11   :  { %608 = vmatpush3.msra.mxu0 %v54_v12  ;;  %341 = vmatpush1.msra.mxu1 %v305_v28  ;;  %p662_p4 = pnand %p661_p3, %p655_p0 }
  0x12   :  { %615 = vmatprep.subr.mxu0 %v677_v7  ;;  %342 = vmatprep.subr.mxu1 %v677_v7 }
  0x13   :  { %343 = vmatpush1.msra.mxu1 %v304_v29 }
  0x14   :  { %344 = vmatprep.subr.mxu1 %v677_v7 }
  0x15   :  { %345 = vmatpush1.msra.mxu1 %v303_v30 }
  0x16   :  { %346 = vmatprep.subr.mxu1 %v677_v7 }
  0x17   :  { %347 = vmatpush1.msra.mxu1 %v302_v31 }
  0x18   :  { %348 = vmatprep.subr.mxu1 %v677_v7 }
  0x19   :  { %349 = vmatpush1.msra.mxu1 %v301_v32 }
  0x1a   :  { %350 = vmatprep.subr.mxu1 %v677_v7 }
  0x1b   :  { %351 = vmatpush1.msra.mxu1 %v300_v33 }
  0x1c   :  { %352 = vmatprep.subr.mxu1 %v677_v7 }
  0x1d   :  { %353 = vmatpush1.msra.mxu1 %v299_v34 }
  0x1e   :  { %354 = vmatprep.subr.mxu1 %v677_v7 }
  0x1f   :  { %355 = vmatpush1.msra.mxu1 %v298_v35 }
  0x20   :  { %356 = vmatprep.subr.mxu1 %v677_v7 }
  0x21   :  { %357 = vmatpush1.msra.mxu1 %v297_v36 }
  0x22   :  { %358 = vmatprep.subr.mxu1 %v677_v7 }
  0x23   :  { %359 = vmatpush1.msra.mxu1 %v296_v37 }
  0x24   :  { %360 = vmatprep.subr.mxu1 %v677_v7 }
  0x25   :  { %361 = vmatpush1.msra.mxu1 %v295_v38 }
  0x26   :  { %386 = vmatprep.subr.mxu1 %v677_v7 }
  0x27   :  { %387 = vmatpush2.msra.mxu1 %v314_v43 }
  0x28   :  { %388 = vmatprep.subr.mxu1 %v677_v7 }
  0x29   :  { %389 = vmatpush2.msra.mxu1 %v313_v44 }
  0x2a   :  { %390 = vmatprep.subr.mxu1 %v677_v7 }
  0x2b   :  { %391 = vmatpush2.msra.mxu1 %v312_v52 }
  0x2c   :  { %392 = vmatprep.subr.mxu1 %v677_v7 }
  0x2d   :  { %393 = vmatpush2.msra.mxu1 %v311_v53 }
  0x7d   :  { %v38_v15 = vpop.permute.xlu1 %37  ;;  %v32_v16 = vpop.permute.xlu0 %31 }
  0x7e   :  { %vm42_vm2 = vcmp.eq.s32.totalorder %v32_v16, %v756_v14  ;;  %vm44_vm3 = vcmp.eq.s32.totalorder %v38_v15, %v756_v14 }
  0x7f   :  { %v561_v17 = vsel %vm42_vm2, 1.0, %v677_v7  ;;  %v563_v20 = vsel %vm44_vm3, 1.0, %v677_v7  ;;  %vm420_vm2 = vcmp.lt.s32.totalorder %v756_v14, 16  ;;  %vm423_vm3 = vcmp.ge.s32.totalorder %v756_v14, 16 }
  0x80   :  { %609 = vmatprep.mubr.msk.f32.mxu0 %vm61_vm1, %v561_v17 }
  0x81   :  { %v41_v18 = vpop.permute.xlu1 %40  ;;  %v35_v19 = vpop.permute.xlu0 %34 }
  0x82   :  { %vm43_vm4 = vcmp.eq.s32.totalorder %v35_v19, %v756_v14  ;;  %vm45_vm5 = vcmp.eq.s32.totalorder %v41_v18, %v756_v14 }
  0x83   :  { %v562_v21 = vsel %vm43_vm4, 1.0, %v677_v7  ;;  %v564_v22 = vsel %vm45_vm5, 1.0, %v677_v7  ;;  %vm424_vm4 = vcmp.lt.s32.totalorder %v756_v14, 32 }
  0x84   :  { %610 = vmatmul.mubr.msk.f32.vlgmr.msra.gmra.mxu0 %vm61_vm1, %v562_v21  ;;  %vm425_vm5 = vmand %vm423_vm3, %vm424_vm4 }
  0x85   :  { %612 = vmatprep.mubr.msk.f32.mxu0 %vm61_vm1, %v563_v20 }
  0x88   :  { %613 = vmatmul.mubr.msk.f32.gmra.mxu0 %vm61_vm1, %v564_v22  ;;  %vm681_vm1 = vmmov 0  }
  0x89   :  { %627 = vmatprep.mubr.msk.f32.mxu0 %vm681_vm1, %v677_v7 }
 0x144   :  { %v611_v41 = vpop.f32.mrf.mxu0 }
 0x145   :  { %v845_v45 = vsel %vm173_vm6, %v611_v41, 0.0  ;;  %vm427_vm6 = vcmp.ge.s32.totalorder %v756_v14, 32 }
 0x146   :  { %v144_v47 = vpop.f32.mrf.mxu0  ;;  %v274_v51 = vrot.slane %v845_v45, 4  ;;  %v214_v58 = vrot.slane %v845_v45, 1  ;;  %v234_v59 = vrot.slane %v845_v45, 2  ;;  %v254_v1 = vrot.slane %v845_v45, 3 }
 0x147   :  { %v849_v48 = vsel %vm168_vm7, %v144_v47, 0.0  ;;  %vm428_vm7 = vcmp.lt.s32.totalorder %v756_v14, 48 }
 0x148   :  { %v614_v49 = vpop.f32.mrf.mxu0  ;;  %v273_v50 = vrot.slane %v849_v48, 4  ;;  %v213_v54 = vrot.slane %v849_v48, 1  ;;  %v233_v55 = vrot.slane %v849_v48, 2  ;;  %v253_v3 = vrot.slane %v849_v48, 3 }
 0x149   :  { %v207_v9 = vsel %vm187_vm11, %v614_v49, 0.0  ;;  %vm435_vm11 = vcmask 392192  }
 0x14a   :  { %v154_v56 = vpop.f32.mrf.mxu0  ;;  %v275_v57 = vsel %vm272_vm8, %v273_v50, %v274_v51  ;;  %v235_v4 = vsel %vm232_vm12, %v233_v55, %v234_v59  ;;  %v215_v6 = vsel %vm212_vm13, %v213_v54, %v214_v58  ;;  %v218_v15 = vrot.slane %v207_v9, 1  ;;  %v464_v54 = vld [vmem:[%s964_s4 + $0x28] sm:$0xff]  ;;  %v463_v55 = vld [vmem:[%s964_s4 + $0x20] sm:$0xff] }
 0x14b   :  { %v867_v60 = vsel %vm182_vm9, %v154_v56, 0.0  ;;  %571 = vmatprep.mubr.msk.f32.mxu1 %vm280_vm10, %v275_v57  ;;  %v255_v16 = vsel %vm252_vm14, %v253_v3, %v254_v1  ;;  %v258_v19 = vrot.slane %v207_v9, 3  ;;  %v238_v20 = vrot.slane %v207_v9, 2  ;;  %616 = vmatpush3.msra.mxu0 %v464_v54  ;;  %v462_v56 = vld [vmem:[%s964_s4 + $0x18] sm:$0xff]  ;;  %v461_v57 = vld [vmem:[%s964_s4 + $0x10] sm:$0xff] }
 0x14c   :  { %v216_v61 = vrot.slane %v867_v60, 1  ;;  %v236_v62 = vrot.slane %v867_v60, 2  ;;  %v256_v63 = vrot.slane %v867_v60, 3  ;;  %v276_v0 = vrot.slane %v867_v60, 4  ;;  %617 = vmatprep.subr.mxu0 %v677_v7 }
 0x14d   :  { %v278_v41 = vrot.slane %v207_v9, 4  ;;  %618 = vmatpush3.msra.mxu0 %v463_v55 }
 0x14e   :  { %v237_v5 = vsel %vm232_vm12, %v234_v59, %v236_v62  ;;  %v217_v8 = vsel %vm212_vm13, %v214_v58, %v216_v61  ;;  %v257_v12 = vsel %vm252_vm14, %v254_v1, %v256_v63  ;;  %v277_v13 = vsel %vm272_vm8, %v274_v51, %v276_v0  ;;  %619 = vmatprep.subr.mxu0 %v677_v7  ;;  %v460_v58 = vld [vmem:[%s964_s4 + $0x8] sm:$0xff]  ;;  %v459_v59 = vld [vmem:[%s964_s4] sm:$0xff] }
 0x14f   :  { %v644_v10 = vpack.i.bf16 %v237_v5, %v235_v4  ;;  %v639_v11 = vpack.i.bf16 %v217_v8, %v215_v6  ;;  %v649_v17 = vpack.i.bf16 %v257_v12, %v255_v16  ;;  %v219_v18 = vsel %vm212_vm13, %v216_v61, %v218_v15  ;;  %620 = vmatpush3.msra.mxu0 %v462_v56 }
 0x150   :  { %v259_v21 = vsel %vm252_vm14, %v256_v63, %v258_v19  ;;  %v239_v22 = vsel %vm232_vm12, %v236_v62, %v238_v20  ;;  %621 = vmatprep.subr.mxu0 %v677_v7  ;;  %v570_v62 = vld [vmem:[%s963_s3] ss:$0 sm:$0xff]  ;;  %vm437_vm12 = vcmask 388096   ;;  %vm457_vm13 = vcmask 1040384  }
 0x151   :  { %645 = vrot.lane.b32.xlu1 %v644_v10, %s678_s2  ;;  %640 = vrot.lane.b32.xlu0 %v639_v11, %s679_s7  ;;  %vm545_vm14 = vcmask 25600  }
 0x152   :  { %622 = vmatpush3.msra.mxu0 %v461_v57 }
 0x153   :  { %623 = vmatprep.subr.mxu0 %v677_v7 }
 0x154   :  { %624 = vmatpush3.msra.mxu0 %v460_v58 }
 0x155   :  { %224 = vrot.lane.b32.xlu1 %v219_v18, %s679_s7  ;;  %650 = vrot.lane.b32.xlu0 %v649_v17, %s680_s8 }
 0x156   :  { %625 = vmatprep.subr.mxu0 %v677_v7 }
 0x157   :  { %626 = vmatpush3.msra.mxu0 %v459_v59 }
 0x159   :  { %264 = vrot.lane.b32.xlu1 %v259_v21, %s680_s8  ;;  %244 = vrot.lane.b32.xlu0 %v239_v22, %s678_s2 }
 0x15d   :  { %246 = vrot.lane.b32.xlu1 %v238_v20, %s678_s2  ;;  %226 = vrot.lane.b32.xlu0 %v218_v15, %s679_s7 }
 0x161   :  { %266 = vrot.lane.b32.xlu0 %v258_v19, %s680_s8 }
 0x1c3   :  { %v646_v23 = vpop.permute.xlu1 %645  ;;  %v641_v24 = vpop.permute.xlu0 %640 }
 0x1c4   :  { %v642_v25 = vunpack.i.l.bf16 %v641_v24  ;;  %v647_v26 = vunpack.i.l.bf16 %v646_v23  ;;  %v643_v27 = vunpack.i.h.bf16 %v641_v24  ;;  %v648_v32 = vunpack.i.h.bf16 %v646_v23 }
 0x1c6   :  { %v281_v28 = vsel %vm280_vm10, %v849_v48, %v642_v25  ;;  %v282_v36 = vsel %vm280_vm10, %v845_v45, %v643_v27  ;;  %v279_v48 = vsel %vm272_vm8, %v276_v0, %v278_v41  ;;  %vm429_vm8 = vmand %vm427_vm6, %vm428_vm7 }
 0x1c7   :  { %v225_v29 = vpop.permute.xlu1 %224  ;;  %v651_v30 = vpop.permute.xlu0 %650  ;;  %v286_v33 = vsel %vm285_vm15, %v281_v28, %v647_v26  ;;  %v287_v42 = vsel %vm285_vm15, %v282_v36, %v648_v32 }
 0x1c8   :  { %v652_v31 = vunpack.i.l.bf16 %v651_v30  ;;  %v653_v34 = vunpack.i.h.bf16 %v651_v30  ;;  %v283_v43 = vsel %vm280_vm10, %v867_v60, %v225_v29  ;;  %v422_v60 = vsel %vm420_vm2, 2, %v676_v2 }
 0x1c9   :  { %v426_v61 = vsel %vm425_vm5, 1, %v422_v60 }
 0x1ca   :  { %v291_v35 = vsel %vm290_vm0, %v286_v33, %v652_v31  ;;  %v292_v44 = vsel %vm290_vm0, %v287_v42, %v653_v34  ;;  %v430_v0 = vsel %vm429_vm8, 0, %v426_v61 }
 0x1cb   :  { %v245_v37 = vpop.permute.xlu0 %244  ;;  %395 = vmatmul.mubr.f32.vlgmr.msra.gmra.mxu1 %v291_v35  ;;  %v265_v38 = vpop.permute.xlu1 %264  ;;  %vm431_vm9 = vcmp.ge.s32.totalorder %v831_v39, %v430_v0 }
 0x1cc   :  { %572 = vmatprep.mubr.msk.f32.mxu1 %vm280_vm10, %v277_v13  ;;  %v288_v46 = vsel %vm285_vm15, %v283_v43, %v245_v37 }
 0x1cd   :  { %v293_v50 = vsel %vm290_vm0, %v288_v46, %v265_v38 }
 0x1cf   :  { %v227_v47 = vpop.permute.xlu0 %226  ;;  %400 = vmatmul.mubr.f32.gmra.mxu1 %v292_v44  ;;  %v247_v45 = vpop.permute.xlu1 %246 }
 0x1d0   :  { %573 = vmatprep.mubr.msk.f32.mxu1 %vm280_vm10, %v279_v48  ;;  %v284_v49 = vsel %vm280_vm10, %v207_v9, %v227_v47 }
 0x1d1   :  { %v289_v52 = vsel %vm285_vm15, %v284_v49, %v247_v45 }
 0x1d3   :  { %v267_v51 = vpop.permute.xlu0 %266  ;;  %405 = vmatmul.mubr.f32.gmra.mxu1 %v293_v50 }
 0x1d4   :  { %574 = vmatprep.mubr.msk.f32.mxu1 %vm280_vm10, %v278_v41  ;;  %v294_v53 = vsel %vm290_vm0, %v289_v52, %v267_v51  ;;  %vm432_vm10 = vcmp.ge.s32.totalorder %v834_v40, %v430_v0  ;;  %v575_v40 = vld [vmem:[%s965_s5] ss:$0 sm:$0xff] }
 0x1d7   :  { %410 = vmatmul.mubr.f32.gmra.mxu1 %v294_v53 }
 0x28b   :  { %v396_v7 = vpop.f32.mrf.mxu1 }
 0x28c   :  { %v397_v63 = vadd.f32 %v570_v62, %v396_v7 }
 0x28d   :  { %v398_v1 = vpop.f32.mrf.mxu1 }
 0x28e   :  { %v415_v3 = vmax.f32 %v397_v63, 0.0 }
 0x28f   :  { %v401_v4 = vpop.f32.mrf.mxu1 }
 0x290   :  { %v402_v2 = vadd.f32 %v570_v62, %v401_v4  ;;  %v433_v14 = vsel %vm431_vm9, %v415_v3, 0.0 }
 0x291   :  { %v403_v5 = vpop.f32.mrf.mxu1  ;;  %v436_v11 = vsel %vm435_vm11, %v433_v14, -inf }
 0x292   :  { %v416_v6 = vmax.f32 %v402_v2, 0.0 }
 0x293   :  { %v406_v8 = vpop.f32.mrf.mxu1 }
 0x294   :  { %v434_v9 = vsel %vm432_vm10, %v416_v6, 0.0  ;;  %v407_v10 = vadd.f32 %v570_v62, %v406_v8 }
 0x295   :  { %v438_v12 = vsel %vm437_vm12, %v434_v9, -inf  ;;  %v408_v13 = vpop.f32.mrf.mxu1 }
 0x296   :  { %v439_v15 = vmax.f32 %v436_v11, %v438_v12  ;;  %v417_v16 = vmax.f32 %v407_v10, 0.0 }
 0x297   :  { %v411_v17 = vpop.f32.mrf.mxu1 }
 0x298   :  { %v440_v18 = vrot.slane %v439_v15, 4  ;;  %v412_v19 = vadd.f32 %v570_v62, %v411_v17  ;;  %v446_v22 = vsel %vm431_vm9, %v417_v16, 0.0 }
 0x299   :  { %v413_v20 = vpop.f32.mrf.mxu1  ;;  %v448_v25 = vsel %vm435_vm11, %v446_v22, -inf }
 0x29a   :  { %v441_v21 = vmax.f32 %v439_v15, %v440_v18  ;;  %v418_v23 = vmax.f32 %v412_v19, 0.0 }
 0x29c   :  { %v447_v24 = vsel %vm432_vm10, %v418_v23, 0.0  ;;  %v442_v27 = vrot.slane %v441_v21, 2 }
 0x29d   :  { %v449_v26 = vsel %vm437_vm12, %v447_v24, -inf }
 0x29e   :  { %v450_v28 = vmax.f32 %v448_v25, %v449_v26  ;;  %v443_v30 = vmax.f32 %v441_v21, %v442_v27 }
 0x2a0   :  { %v451_v29 = vrot.slane %v450_v28, 4  ;;  %v444_v33 = vrot.slane %v443_v30, 1 }
 0x2a2   :  { %v452_v31 = vmax.f32 %v450_v28, %v451_v29  ;;  %v445_v39 = vmax.f32 %v443_v30, %v444_v33 }
 0x2a4   :  { %v453_v32 = vrot.slane %v452_v31, 2 }
 0x2a6   :  { %v454_v34 = vmax.f32 %v452_v31, %v453_v32 }
 0x2a8   :  { %v455_v35 = vrot.slane %v454_v34, 1 }
 0x2aa   :  { %v456_v36 = vmax.f32 %v454_v34, %v455_v35 }
 0x2ac   :  { %v458_v37 = vsel %vm457_vm13, %v445_v39, %v456_v36 }
 0x2ad   :  { %628 = vmatmul.mubr.msk.f32.vlgmr.msra.gmra.mxu0 %vm435_vm11, %v458_v37 }
 0x36d   :  { %v541_v38 = vpop.f32.mrf.mxu0 }
 0x36e   :  { %v542_v41 = vadd.f32 %v575_v40, %v541_v38 }
 0x36f   :  { %v629_v42 = vpop.f32.mrf.mxu0 }
 0x370   :  { %546 = vst.msk [vmem:[#allocation2] sm:$0x3] %vm545_vm14, %v542_v41 }
 0x371   :  { %665 = shalt.err (!%p662_p4)
}
 0x372   :  { %556 = dma.vmem_to_hbm [thread:$0]  %s554_s22, 32, %s966_s6, [#allocation3]  }
 0x373   :  { %674 = dma.done.wait [#allocation3], 32  }
 0x374   :  { %675 = vsyncadd [#allocation3], 4294967264 }
 0x375   :  { %560 = vsyncpa [#allocation3], 1 }

</bundles_post_ra>
